<compile_context>
chip_gen: v5e
topology: v5e:2x2
jax: 0.10.0
libtpu: 0.0.40
codegen_flags: <defaults>
</compile_context>

<pallas_src>
import numpy as np
import jax
import jax.numpy as jnp
from jax.experimental import pallas as pl
from jax.experimental.pallas import tpu as pltpu


# Sublane offsets of the folded epilogue constants inside the single
# concatenated (CONST_ROWS, 1) f32 operand.  All offsets are multiples of 8 so
# the static ref slices inside the kernel never cross an (8, 128) tile boundary.
_CSCALE = (0, 80)     # conv BN scale, replicated over even/odd halves  (80 rows)
_CSHIFT = (80, 160)   # conv bias + BN shift, replicated                (80 rows)
_S1 = (160, 288)      # fc1 BN scale                                    (128 rows)
_B1 = (288, 416)      # fc1 bias + BN shift                             (128 rows)
_B2 = (416, 480)      # fc2 bias                                        (64 rows)
_W3 = (480, 544)      # fc3 weight column                               (64 rows)
_B3 = (544, 545)      # fc3 bias                                        (1 row)
CONST_ROWS = 552      # 545 rounded up to a multiple of 8


def dnn_kernel(x_ref, wcat_ref, w1_ref, w2_ref, const_ref, o_ref):
    x = x_ref[...]                                                       # (10, tn) bf16

    # conv_block: Toeplitz matmul (even rows 0:40, odd rows 40:80), folded
    # BatchNorm1d(8) affine, then MaxPool1d(2) + ReLU as max of the two
    # sublane halves and 0 (relu∘max == max∘relu, halves the ReLU lane work).
    y = jnp.dot(wcat_ref[...], x, preferred_element_type=jnp.float32)   # (80, tn) f32
    y = y * const_ref[_CSCALE[0]:_CSCALE[1], :] + const_ref[_CSHIFT[0]:_CSHIFT[1], :]
    pooled = jnp.maximum(jnp.maximum(y[:40, :], y[40:, :]), 0.0)        # (40, tn)

    # fc_block: Linear(40,128) + folded BN(128) + ReLU (Dropout identity in eval)
    h1 = jnp.dot(w1_ref[...], pooled.astype(w1_ref.dtype),
                 preferred_element_type=jnp.float32)                    # (128, tn)
    h1 = jnp.maximum(h1 * const_ref[_S1[0]:_S1[1], :]
                     + const_ref[_B1[0]:_B1[1], :], 0.0)

    # Linear(128, 64) + ReLU
    h2 = jnp.dot(w2_ref[...], h1.astype(w2_ref.dtype),
                 preferred_element_type=jnp.float32)                    # (64, tn)
    h2 = jnp.maximum(h2 + const_ref[_B2[0]:_B2[1], :], 0.0)

    # Linear(64, 1): per-sublane scale + sublane sum -> lane-dense (1, tn) row.
    out = jnp.sum(h2 * const_ref[_W3[0]:_W3[1], :], axis=0, keepdims=True)
    o_ref[...] = (out + const_ref[_B3[0]:_B3[1], :]).astype(o_ref.dtype)  # (1, tn)


def init_params(key):
    """Deterministic PyTorch-style (uniform kaiming) initialization."""
    ks = jax.random.split(key, 10)

    def u(k, shape, fan_in):
        bound = 1.0 / np.sqrt(fan_in)
        return jax.random.uniform(k, shape, jnp.float32, -bound, bound)

    return {
        # Conv1d(1, 8, kernel_size=3)
        "wc": u(ks[0], (8, 1, 3), 1 * 3),
        "bc": u(ks[1], (8,), 1 * 3),
        # Linear(40, 128), Linear(128, 64), Linear(64, 1)  (PyTorch stores (out, in))
        "w1": u(ks[2], (128, 40), 40), "b1": u(ks[3], (128,), 40),
        "w2": u(ks[4], (64, 128), 128), "b2": u(ks[5], (64,), 128),
        "w3": u(ks[6], (1, 64), 64),   "b3": u(ks[7], (1,), 64),
        # BatchNorm1d(8) / BatchNorm1d(128): fresh (gamma=1, beta=0, mean=0, var=1)
        "bn8_gamma": jnp.ones((8,)),  "bn8_beta": jnp.zeros((8,)),
        "bn8_mean": jnp.zeros((8,)),  "bn8_var": jnp.ones((8,)),
        "bn128_gamma": jnp.ones((128,)), "bn128_beta": jnp.zeros((128,)),
        "bn128_mean": jnp.zeros((128,)), "bn128_var": jnp.ones((128,)),
    }


def build_kernel_operands(params, eps=1e-5):
    """Glue: transposed Toeplitz conv matrix, folded BN affines, one const column."""
    wc = np.asarray(params["wc"])       # (8, 1, 3)
    bc = np.asarray(params["bc"])       # (8,)
    L, C, K = 10, 8, 3
    P = L // 2                          # pooled length 5

    # Transposed Toeplitz: row r = half*40 + c*5 + j covers output time
    # t = 2*j + half of channel c;  w_t[r, ti] = wc[c, 0, k], ti = t + k - 1.
    w_t = np.zeros((2 * C * P, L), dtype=np.float32)
    for c in range(C):
        for j in range(P):
            for half in (0, 1):
                t = 2 * j + half
                r = half * C * P + c * P + j
                for k in range(K):
                    ti = t + k - 1
                    if 0 <= ti < L:
                        w_t[r, ti] = wc[c, 0, k]

    # Fold Conv bias + BatchNorm1d(8) (eval) into a per-row affine, replicated
    # over the 5 pooled positions of each channel and over even/odd halves.
    inv8 = np.asarray(params["bn8_gamma"]) / np.sqrt(np.asarray(params["bn8_var"]) + eps)
    csc = np.tile(np.repeat(inv8, P), 2)                                   # (80,)
    csh = np.tile(np.repeat((bc - np.asarray(params["bn8_mean"])) * inv8
                            + np.asarray(params["bn8_beta"]), P), 2)       # (80,)

    # Fold Linear(40,128) bias + BatchNorm1d(128) (eval).
    inv128 = np.asarray(params["bn128_gamma"]) / np.sqrt(np.asarray(params["bn128_var"]) + eps)
    s1 = inv128
    b1 = ((np.asarray(params["b1"]) - np.asarray(params["bn128_mean"])) * inv128
          + np.asarray(params["bn128_beta"]))

    consts = np.zeros((CONST_ROWS, 1), dtype=np.float32)
    consts[_CSCALE[0]:_CSCALE[1], 0] = csc
    consts[_CSHIFT[0]:_CSHIFT[1], 0] = csh
    consts[_S1[0]:_S1[1], 0] = s1
    consts[_B1[0]:_B1[1], 0] = b1
    consts[_B2[0]:_B2[1], 0] = np.asarray(params["b2"])
    consts[_W3[0]:_W3[1], 0] = np.asarray(params["w3"])[0]
    consts[_B3[0]:_B3[1], 0] = np.asarray(params["b3"])

    bf16 = jnp.bfloat16
    return [
        jnp.asarray(w_t).astype(bf16),              # (80, 10)   MXU, fused conv
        jnp.asarray(params["w1"]).astype(bf16),     # (128, 40)  MXU, fc1 (PyTorch (out,in))
        jnp.asarray(params["w2"]).astype(bf16),     # (64, 128)  MXU, fc2
        jnp.asarray(consts),                        # (552, 1)   f32 epilogue constants
    ]


def dnn_forward(x, operands, tile_n=2048):
    n = x.shape[0]
    # Batch lives on lanes: tile must be a multiple of 128; large tiles
    # amortize the ~0.35 us per-grid-step overhead.
    n_min = ((n + 127) // 128) * 128
    tn = min(tile_n, n_min)
    if n_min >= 4 * 128:
        # Cap the tile so the grid has >= 4 blocks: lets the v7x megacore
        # shard the (parallel) batch axis across both TensorCores.
        tn = min(tn, ((n_min // 4 + 127) // 128) * 128)
    n_pad = pl.cdiv(n, tn) * tn

    # Batch-on-lanes: (n, 10) -> (10, n_pad) bf16 with zero-padded lanes.
    xt = x.astype(jnp.bfloat16).T
    if n_pad != n:
        xt = jnp.pad(xt, ((0, 0), (0, n_pad - n)))

    # Weights / constants are tiny: whole-array blocks with constant index_map
    # so they are DMA'd once and stay VMEM-resident across all grid steps.
    weight_specs = [pl.BlockSpec(op.shape, lambda i: (0, 0)) for op in operands]

    flops = 2 * n_pad * (80 * 10 + 128 * 40 + 64 * 128 + 64)
    bytes_accessed = (n_pad * (10 * 2 + 4)
                      + sum(int(np.prod(op.shape)) * op.dtype.itemsize for op in operands))

    out = pl.pallas_call(
        dnn_kernel,
        out_shape=jax.ShapeDtypeStruct((1, n_pad), jnp.float32),
        grid=(n_pad // tn,),
        in_specs=[pl.BlockSpec((10, tn), lambda i: (0, i))] + weight_specs,
        out_specs=pl.BlockSpec((1, tn), lambda i: (0, i)),       # lane-dense store
        compiler_params=pltpu.CompilerParams(
            dimension_semantics=("parallel",),    # megacore sharding on v7x
            vmem_limit_bytes=32 * 1024 * 1024,    # ample headroom, even on v7x
        ),
        cost_estimate=pl.CostEstimate(
            flops=flops, transcendentals=0, bytes_accessed=bytes_accessed),
    )(xt, *operands)
    # Padded lanes hold garbage (biases/shifts propagate): slice before any use.
    return out[0, :n][:, None]


def dnn_reference(x, operands):
    """Pure-JAX reference with identical math/dtypes, for a correctness check."""
    wcat, w1, w2, consts = operands
    xt = x.astype(jnp.bfloat16).T
    y = jnp.dot(wcat, xt, preferred_element_type=jnp.float32)
    y = y * consts[_CSCALE[0]:_CSCALE[1]] + consts[_CSHIFT[0]:_CSHIFT[1]]
    p = jnp.maximum(jnp.maximum(y[:40], y[40:]), 0.0)
    h1 = jnp.dot(w1, p.astype(jnp.bfloat16), preferred_element_type=jnp.float32)
    h1 = jnp.maximum(h1 * consts[_S1[0]:_S1[1]] + consts[_B1[0]:_B1[1]], 0.0)
    h2 = jnp.dot(w2, h1.astype(jnp.bfloat16), preferred_element_type=jnp.float32)
    h2 = jnp.maximum(h2 + consts[_B2[0]:_B2[1]], 0.0)
    out = (jnp.sum(h2 * consts[_W3[0]:_W3[1]], axis=0, keepdims=True)
           + consts[_B3[0]:_B3[1]])
    return out.T                                                  # (n, 1)


if __name__ == "__main__":
    key = jax.random.PRNGKey(0)
    pkey, xkey = jax.random.split(key)

    params = init_params(pkey)
    operands = build_kernel_operands(params)

    # Input implied by the module: Linear(40) <- 8 channels * 5 pooled = conv length 10.
    batch, feat = 8, 10
    x = jax.random.normal(xkey, (batch, feat), jnp.float32)

    out = jax.block_until_ready(dnn_forward(x, operands))
    ref = dnn_reference(x, operands)

    assert out.shape == (batch, 1)
    assert jnp.allclose(out, ref, rtol=1e-2, atol=1e-2)

    print("KERNEL_OK")
</pallas_src>

<mosaic_0001>
module attributes {stable_mosaic.version = 11 : i64} {
  func.func @dnn_kernel(%arg0: i32, %arg1: memref<10x128xbf16, #tpu.memory_space<vmem>>, %arg2: memref<80x10xbf16, #tpu.memory_space<vmem>>, %arg3: memref<128x40xbf16, #tpu.memory_space<vmem>>, %arg4: memref<64x128xbf16, #tpu.memory_space<vmem>>, %arg5: memref<552x1xf32, #tpu.memory_space<vmem>>, %arg6: memref<1x128xf32, #tpu.memory_space<vmem>>) attributes {dimension_semantics = [#tpu.dimension_semantics<parallel>], iteration_bounds = array<i64: 1>, scalar_prefetch = 0 : i64, scratch_operands = 0 : i64, tpu.core_type = #tpu.core_type<tc>, window_params = [{transform_indices = @transform_0, window_bounds = array<i64: 10, 128>}, {pipeline_mode = #tpu.pipeline_mode<synchronous>, transform_indices = @transform_1, window_bounds = array<i64: 80, 10>}, {pipeline_mode = #tpu.pipeline_mode<synchronous>, transform_indices = @transform_2, window_bounds = array<i64: 128, 40>}, {pipeline_mode = #tpu.pipeline_mode<synchronous>, transform_indices = @transform_3, window_bounds = array<i64: 64, 128>}, {pipeline_mode = #tpu.pipeline_mode<synchronous>, transform_indices = @transform_4, window_bounds = array<i64: 552, 1>}, {transform_indices = @transform_5, window_bounds = array<i64: 1, 128>}]} {
    %c0 = arith.constant 0 : index
    %c0_0 = arith.constant 0 : index
    %0 = vector.load %arg1[%c0, %c0_0] : memref<10x128xbf16, #tpu.memory_space<vmem>>, vector<10x128xbf16>
    %c0_1 = arith.constant 0 : index
    %c0_2 = arith.constant 0 : index
    %1 = vector.load %arg2[%c0_1, %c0_2] : memref<80x10xbf16, #tpu.memory_space<vmem>>, vector<80x10xbf16>
    %cst = arith.constant dense<0.000000e+00> : vector<80x128xf32>
    %2 = tpu.matmul %1, %0, %cst {dimension_numbers = #tpu.dot_dimension_numbers<[1], [0], [0], [1], [0, 0, 1, 1], [], []>} : vector<80x10xbf16>, vector<10x128xbf16>, vector<80x128xf32> -> vector<80x128xf32>
    %c0_3 = arith.constant 0 : index
    %c0_4 = arith.constant 0 : index
    %3 = vector.load %arg5[%c0_3, %c0_4] : memref<552x1xf32, #tpu.memory_space<vmem>>, vector<80x1xf32>
    %4 = vector.broadcast %3 : vector<80x1xf32> to vector<80x128xf32>
    %5 = arith.mulf %2, %4 : vector<80x128xf32>
    %c80 = arith.constant 80 : index
    %c0_5 = arith.constant 0 : index
    %6 = vector.load %arg5[%c80, %c0_5] : memref<552x1xf32, #tpu.memory_space<vmem>>, vector<80x1xf32>
    %7 = vector.broadcast %6 : vector<80x1xf32> to vector<80x128xf32>
    %8 = arith.addf %5, %7 : vector<80x128xf32>
    %9 = vector.extract_strided_slice %8 {offsets = [0, 0], sizes = [40, 128], strides = [1, 1]} : vector<80x128xf32> to vector<40x128xf32>
    %10 = vector.extract_strided_slice %8 {offsets = [40, 0], sizes = [40, 128], strides = [1, 1]} : vector<80x128xf32> to vector<40x128xf32>
    %11 = arith.maximumf %9, %10 : vector<40x128xf32>
    %cst_6 = arith.constant 0.000000e+00 : f32
    %12 = vector.broadcast %cst_6 : f32 to vector<40x128xf32>
    %13 = arith.maximumf %11, %12 : vector<40x128xf32>
    %c0_7 = arith.constant 0 : index
    %c0_8 = arith.constant 0 : index
    %14 = vector.load %arg3[%c0_7, %c0_8] : memref<128x40xbf16, #tpu.memory_space<vmem>>, vector<128x40xbf16>
    %15 = arith.truncf %13 : vector<40x128xf32> to vector<40x128xbf16>
    %cst_9 = arith.constant dense<0.000000e+00> : vector<128x128xf32>
    %16 = tpu.matmul %14, %15, %cst_9 {dimension_numbers = #tpu.dot_dimension_numbers<[1], [0], [0], [1], [0, 0, 1, 1], [], []>} : vector<128x40xbf16>, vector<40x128xbf16>, vector<128x128xf32> -> vector<128x128xf32>
    %c160 = arith.constant 160 : index
    %c0_10 = arith.constant 0 : index
    %17 = vector.load %arg5[%c160, %c0_10] : memref<552x1xf32, #tpu.memory_space<vmem>>, vector<128x1xf32>
    %18 = vector.broadcast %17 : vector<128x1xf32> to vector<128x128xf32>
    %19 = arith.mulf %16, %18 : vector<128x128xf32>
    %c288 = arith.constant 288 : index
    %c0_11 = arith.constant 0 : index
    %20 = vector.load %arg5[%c288, %c0_11] : memref<552x1xf32, #tpu.memory_space<vmem>>, vector<128x1xf32>
    %21 = vector.broadcast %20 : vector<128x1xf32> to vector<128x128xf32>
    %22 = arith.addf %19, %21 : vector<128x128xf32>
    %cst_12 = arith.constant 0.000000e+00 : f32
    %23 = vector.broadcast %cst_12 : f32 to vector<128x128xf32>
    %24 = arith.maximumf %22, %23 : vector<128x128xf32>
    %c0_13 = arith.constant 0 : index
    %c0_14 = arith.constant 0 : index
    %25 = vector.load %arg4[%c0_13, %c0_14] : memref<64x128xbf16, #tpu.memory_space<vmem>>, vector<64x128xbf16>
    %26 = arith.truncf %24 : vector<128x128xf32> to vector<128x128xbf16>
    %cst_15 = arith.constant dense<0.000000e+00> : vector<64x128xf32>
    %27 = tpu.matmul %25, %26, %cst_15 {dimension_numbers = #tpu.dot_dimension_numbers<[1], [0], [0], [1], [0, 0, 1, 1], [], []>} : vector<64x128xbf16>, vector<128x128xbf16>, vector<64x128xf32> -> vector<64x128xf32>
    %c416 = arith.constant 416 : index
    %c0_16 = arith.constant 0 : index
    %28 = vector.load %arg5[%c416, %c0_16] : memref<552x1xf32, #tpu.memory_space<vmem>>, vector<64x1xf32>
    %29 = vector.broadcast %28 : vector<64x1xf32> to vector<64x128xf32>
    %30 = arith.addf %27, %29 : vector<64x128xf32>
    %cst_17 = arith.constant 0.000000e+00 : f32
    %31 = vector.broadcast %cst_17 : f32 to vector<64x128xf32>
    %32 = arith.maximumf %30, %31 : vector<64x128xf32>
    %c480 = arith.constant 480 : index
    %c0_18 = arith.constant 0 : index
    %33 = vector.load %arg5[%c480, %c0_18] : memref<552x1xf32, #tpu.memory_space<vmem>>, vector<64x1xf32>
    %34 = vector.broadcast %33 : vector<64x1xf32> to vector<64x128xf32>
    %35 = arith.mulf %32, %34 : vector<64x128xf32>
    %cst_19 = arith.constant dense<0.000000e+00> : vector<128xf32>
    %36 = vector.multi_reduction <add>, %35, %cst_19 [0] : vector<64x128xf32> to vector<128xf32>
    %37 = vector.shape_cast %36 : vector<128xf32> to vector<1x128xf32>
    %c544 = arith.constant 544 : index
    %c0_20 = arith.constant 0 : index
    %38 = vector.load %arg5[%c544, %c0_20] : memref<552x1xf32, #tpu.memory_space<vmem>>, vector<1x1xf32>
    %39 = vector.broadcast %38 : vector<1x1xf32> to vector<1x128xf32>
    %40 = arith.addf %37, %39 : vector<1x128xf32>
    %c0_21 = arith.constant 0 : index
    %c0_22 = arith.constant 0 : index
    %41 = vector.load %arg6[%c0_21, %c0_22] : memref<1x128xf32, #tpu.memory_space<vmem>>, vector<1x128xf32>
    tpu.vector_store %arg6[%c0_21, %c0_22], %40 {strides = array<i32>} : memref<1x128xf32, #tpu.memory_space<vmem>>, vector<1x128xf32>,
    return
  }
  func.func @transform_0(%arg0: i32) -> (i32, i32) {
    %c0_i32 = arith.constant 0 : i32
    %c0_i32_0 = arith.constant 0 : i32
    return %c0_i32, %arg0 : i32, i32
  }
  func.func @transform_1(%arg0: i32) -> (i32, i32) {
    %c0_i32 = arith.constant 0 : i32
    %c0_i32_0 = arith.constant 0 : i32
    %c0_i32_1 = arith.constant 0 : i32
    return %c0_i32, %c0_i32_0 : i32, i32
  }
  func.func @transform_2(%arg0: i32) -> (i32, i32) {
    %c0_i32 = arith.constant 0 : i32
    %c0_i32_0 = arith.constant 0 : i32
    %c0_i32_1 = arith.constant 0 : i32
    return %c0_i32, %c0_i32_0 : i32, i32
  }
  func.func @transform_3(%arg0: i32) -> (i32, i32) {
    %c0_i32 = arith.constant 0 : i32
    %c0_i32_0 = arith.constant 0 : i32
    %c0_i32_1 = arith.constant 0 : i32
    return %c0_i32, %c0_i32_0 : i32, i32
  }
  func.func @transform_4(%arg0: i32) -> (i32, i32) {
    %c0_i32 = arith.constant 0 : i32
    %c0_i32_0 = arith.constant 0 : i32
    %c0_i32_1 = arith.constant 0 : i32
    return %c0_i32, %c0_i32_0 : i32, i32
  }
  func.func @transform_5(%arg0: i32) -> (i32, i32) {
    %c0_i32 = arith.constant 0 : i32
    %c0_i32_0 = arith.constant 0 : i32
    return %c0_i32, %arg0 : i32, i32
  }
}

</mosaic_0001>

<bundles_post_ra>
// kernel: tpu_custom_call.1
= control target key start
LH: loop header
LB: loop body
LE: loop exit
PB: predicated region body
PF: predicated region fallthrough
CT: control target
= control target key end

     0   :  { %v1000_v3 = vmov 0   ;;  %vm80_vm0 = vcmask 1044480   ;;  %vm64_vm1 = vcmask 80896   ;;  %s1384_s0 = inlined_call_operand.vmem [shape: bf16[10,128], index: 0, kind: input, shape index: {}]   ;;  %s1385_s1 = inlined_call_operand.vmem [shape: bf16[80,10], index: 1, kind: input, shape index: {}]   ;;  %s1386_s2 = inlined_call_operand.vmem [shape: bf16[128,40], index: 2, kind: input, shape index: {}]   ;;  %s1387_s3 = inlined_call_operand.vmem [shape: bf16[64,128], index: 3, kind: input, shape index: {}]   ;;  %s1388_s4 = inlined_call_operand.vmem [shape: f32[552,1], index: 4, kind: input, shape index: {}]   ;;  %s1389_s5 = inlined_call_operand.hbm [shape: f32[1,128], index: 5, kind: output, shape index: {}]  }
   0x1   :  { %v192_v0 = vld [vmem:[%s1388_s4 + $0x70] sm:$0xff]  ;;  %v122_v1 = vld [vmem:[%s1388_s4 + $0x20] sm:$0xff]  ;;  %973 = vset.pattern.permute.xlu2 %v1000_v3  ;;  %972 = vset.pattern.permute.xlu1 %v1000_v3 }
   0x2   :  { %v120_v2 = vld [vmem:[%s1388_s4 + $0x10] sm:$0xff]  ;;  %v885_v4 = vld [vmem:[%s1384_s0] sm:$0xf]  ;;  %v948_v5 = vld [vmem:[%s1384_s0] sm:$0x10]  ;;  %971 = vset.pattern.permute.xlu0 %v1000_v3  ;;  %220 = vperm.xlu1 %972, %v192_v0  }
   0x3   :  { %v886_v6 = vor.u32 %v948_v5, %v885_v4  ;;  %150 = vperm.xlu0 %971, %v122_v1   ;;  %140 = vperm.xlu2 %973, %v120_v2   ;;  %v949_v8 = vld [vmem:[%s1385_s1] sm:$0xff] }
   0x5   :  { %v82_v7 = vsel %vm80_vm0, %v886_v6, 0 }
   0x6   :  { %91 = vmatpush.bf16.msra.mxu0 %v82_v7 }
   0x7   :  { %10 = vsyncpa [#allocation3], 0  ;;  %v197_v9 = vld [vmem:[%s1388_s4 + $0x98] sm:$0xff]  ;;  %v127_v10 = vld [vmem:[%s1388_s4 + $0x48] sm:$0xff]  ;;  %vm352_vm2 = vcmask 1043456   ;;  %vm327_vm3 = vcmask 326656  }
   0x8   :  { %v121_v11 = vld [vmem:[%s1388_s4 + $0x18] sm:$0xff]  ;;  %v126_v12 = vld [vmem:[%s1388_s4 + $0x40] sm:$0xff]  ;;  %v950_v15 = vld [vmem:[%s1385_s1 + $0x8] sm:$0xff]  ;;  %s854_s9 = sshll.u32 %s1389_s5, 4  ;;  %s855_s9 = int_to_ptr.hbm [resolvable:$true] %s854_s9 }
   0x9   :  { %887 = vmatmul.msk.bf16.vlgmr.msra.gmra.mxu0 %vm64_vm1, %v949_v8  ;;  %v125_v13 = vld [vmem:[%s1388_s4 + $0x38] sm:$0xff]  ;;  %v190_v14 = vld [vmem:[%s1388_s4 + $0x60] sm:$0xff]  ;;  %v195_v16 = vld [vmem:[%s1388_s4 + $0x88] sm:$0xff] }
   0xa   :  { %245 = vperm.xlu1 %972, %v197_v9   ;;  %v191_v17 = vld [vmem:[%s1388_s4 + $0x68] sm:$0xff]  ;;  %v196_v18 = vld [vmem:[%s1388_s4 + $0x90] sm:$0xff]  ;;  %v118_v21 = vld [vmem:[%s1388_s4] sm:$0xff] }
   0xb   :  { %175 = vperm.xlu0 %971, %v127_v10   ;;  %145 = vperm.xlu2 %973, %v121_v11   ;;  %v119_v19 = vld [vmem:[%s1388_s4 + $0x8] sm:$0xff]  ;;  %v951_v22 = vld [vmem:[%s1385_s1 + $0x10] sm:$0xff]  ;;  %v189_v24 = vld [vmem:[%s1388_s4 + $0x58] sm:$0xff] }
   0xc   :  { %v123_v20 = vld [vmem:[%s1388_s4 + $0x28] sm:$0xff]  ;;  %v188_v23 = vld [vmem:[%s1388_s4 + $0x50] sm:$0xff]  ;;  %v194_v26 = vld [vmem:[%s1388_s4 + $0x80] sm:$0xff] }
   0xd   :  { %v124_v25 = vld [vmem:[%s1388_s4 + $0x30] sm:$0xff]  ;;  %v405_v27 = vld [vmem:[%s1388_s4 + $0xa0] sm:$0xff]  ;;  %v193_v28 = vld [vmem:[%s1388_s4 + $0x78] sm:$0xff] }
   0xe   :  { %v952_v29 = vld [vmem:[%s1385_s1 + $0x18] sm:$0xff]  ;;  %v531_v31 = vld [vmem:[%s1388_s4 + $0x190] sm:$0xff]  ;;  %v417_v33 = vld [vmem:[%s1388_s4 + $0x100] sm:$0xff] }
   0xf   :  { %v420_v30 = vld [vmem:[%s1388_s4 + $0x118] sm:$0xff]  ;;  %v419_v32 = vld [vmem:[%s1388_s4 + $0x110] sm:$0xff]  ;;  %v418_v34 = vld [vmem:[%s1388_s4 + $0x108] sm:$0xff] }
  0x10   :  { %v532_v35 = vld [vmem:[%s1388_s4 + $0x198] sm:$0xff]  ;;  %v953_v36 = vld [vmem:[%s1385_s1 + $0x20] sm:$0xff]  ;;  %v530_v37 = vld [vmem:[%s1388_s4 + $0x188] sm:$0xff] }
  0x11   :  { %v415_v38 = vld [vmem:[%s1388_s4 + $0xf0] sm:$0xff]  ;;  %v529_v39 = vld [vmem:[%s1388_s4 + $0x180] sm:$0xff]  ;;  %v528_v41 = vld [vmem:[%s1388_s4 + $0x178] sm:$0xff] }
  0x12   :  { %170 = vperm.xlu1 %972, %v126_v12   ;;  %v527_v40 = vld [vmem:[%s1388_s4 + $0x170] sm:$0xff]  ;;  %v416_v42 = vld [vmem:[%s1388_s4 + $0xf8] sm:$0xff]  ;;  %v414_v43 = vld [vmem:[%s1388_s4 + $0xe8] sm:$0xff] }
  0x13   :  { %165 = vperm.xlu0 %971, %v125_v13   ;;  %210 = vperm.xlu2 %973, %v190_v14   ;;  %v525_v44 = vld [vmem:[%s1388_s4 + $0x160] sm:$0xff]  ;;  %v411_v46 = vld [vmem:[%s1388_s4 + $0xd0] sm:$0xff]  ;;  %v412_v47 = vld [vmem:[%s1388_s4 + $0xd8] sm:$0xff] }
  0x14   :  { %v413_v45 = vld [vmem:[%s1388_s4 + $0xe0] sm:$0xff]  ;;  %v526_v48 = vld [vmem:[%s1388_s4 + $0x168] sm:$0xff]  ;;  %v524_v49 = vld [vmem:[%s1388_s4 + $0x158] sm:$0xff] }
  0x15   :  { %v409_v50 = vld [vmem:[%s1388_s4 + $0xc0] sm:$0xff]  ;;  %v523_v51 = vld [vmem:[%s1388_s4 + $0x150] sm:$0xff]  ;;  %v522_v53 = vld [vmem:[%s1388_s4 + $0x148] sm:$0xff] }
  0x16   :  { %v521_v52 = vld [vmem:[%s1388_s4 + $0x140] sm:$0xff]  ;;  %v410_v54 = vld [vmem:[%s1388_s4 + $0xc8] sm:$0xff]  ;;  %v408_v55 = vld [vmem:[%s1388_s4 + $0xb8] sm:$0xff] }
  0x17   :  { %v519_v57 = vld [vmem:[%s1388_s4 + $0x130] sm:$0xff]  ;;  %v406_v60 = vld [vmem:[%s1388_s4 + $0xa8] sm:$0xff]  ;;  %v517_v61 = vld [vmem:[%s1388_s4 + $0x120] sm:$0xff] }
  0x18   :  { %v407_v58 = vld [vmem:[%s1388_s4 + $0xb0] sm:$0xff]  ;;  %v520_v62 = vld [vmem:[%s1388_s4 + $0x138] sm:$0xff]  ;;  %v661_v3 = vld [vmem:[%s1388_s4 + $0x1a0] sm:$0xff] }
  0x19   :  { %888 = vmatmul.msk.bf16.gmra.mxu0 %vm64_vm1, %v950_v15  ;;  %v662_v4 = vld [vmem:[%s1388_s4 + $0x1a8] sm:$0xff]  ;;  %v664_v9 = vld [vmem:[%s1388_s4 + $0x1b8] sm:$0xff]  ;;  %v665_v11 = vld [vmem:[%s1388_s4 + $0x1c0] sm:$0xff] }
  0x1a   :  { %235 = vperm.xlu1 %972, %v195_v16   ;;  %v518_v5 = vld [vmem:[%s1388_s4 + $0x128] sm:$0xff]  ;;  %v663_v12 = vld [vmem:[%s1388_s4 + $0x1b0] sm:$0xff]  ;;  %v770_v15 = vld [vmem:[%s1388_s4 + $0x1e0] sm:$0xff] }
  0x1b   :  { %215 = vperm.xlu0 %971, %v191_v17   ;;  %240 = vperm.xlu2 %973, %v196_v18   ;;  %v771_v16 = vld [vmem:[%s1388_s4 + $0x1e8] sm:$0xff] }
  0x1c   :  { %v666_v17 = vld [vmem:[%s1388_s4 + $0x1c8] sm:$0xff] }
  0x22   :  { %135 = vperm.xlu1 %972, %v119_v19  }
  0x23   :  { %155 = vperm.xlu2 %973, %v123_v20   ;;  %130 = vperm.xlu0 %971, %v118_v21   ;;  %v773_v21 = vld [vmem:[%s1388_s4 + $0x1f8] sm:$0xff] }
  0x29   :  { %889 = vmatmul.msk.bf16.gmra.mxu0 %vm64_vm1, %v951_v22 }
  0x2a   :  { %200 = vperm.xlu1 %972, %v188_v23   ;;  %v667_v23 = vld [vmem:[%s1388_s4 + $0x1d0] sm:$0xff] }
  0x2b   :  { %205 = vperm.xlu2 %973, %v189_v24   ;;  %160 = vperm.xlu0 %971, %v124_v25   ;;  %v772_v24 = vld [vmem:[%s1388_s4 + $0x1f0] sm:$0xff] }
  0x32   :  { %230 = vperm.xlu1 %972, %v194_v26  }
  0x33   :  { %423 = vperm.xlu2 %973, %v405_v27   ;;  %225 = vperm.xlu0 %971, %v193_v28   ;;  %v668_v28 = vld [vmem:[%s1388_s4 + $0x1d8] sm:$0xff] }
  0x39   :  { %890 = vmatmul.msk.bf16.gmra.mxu0 %vm64_vm1, %v952_v29  ;;  %v775_v29 = vld [vmem:[%s1388_s4 + $0x208] sm:$0xff] }
  0x3a   :  { %498 = vperm.xlu1 %972, %v420_v30   ;;  %v774_v30 = vld [vmem:[%s1388_s4 + $0x200] sm:$0xff] }
  0x3b   :  { %605 = vperm.xlu2 %973, %v531_v31   ;;  %493 = vperm.xlu0 %971, %v419_v32  }
  0x42   :  { %483 = vperm.xlu1 %972, %v417_v33  }
  0x43   :  { %488 = vperm.xlu2 %973, %v418_v34   ;;  %610 = vperm.xlu0 %971, %v532_v35   ;;  %v777_v35 = vld [vmem:[%s1388_s4 + $0x218] sm:$0xff] }
  0x49   :  { %891 = vmatmul.msk.bf16.gmra.mxu0 %vm64_vm1, %v953_v36  ;;  %v839_v36 = vld [vmem:[%s1388_s4 + $0x220] sm:$0x1] }
  0x4a   :  { %600 = vperm.xlu1 %972, %v530_v37   ;;  %v776_v37 = vld [vmem:[%s1388_s4 + $0x210] sm:$0xff] }
  0x4b   :  { %473 = vperm.xlu2 %973, %v415_v38   ;;  %595 = vperm.xlu0 %971, %v529_v39  }
  0x52   :  { %585 = vperm.xlu1 %972, %v527_v40  }
  0x53   :  { %590 = vperm.xlu2 %973, %v528_v41   ;;  %478 = vperm.xlu0 %971, %v416_v42  }
  0x5a   :  { %468 = vperm.xlu1 %972, %v414_v43  }
  0x5b   :  { %575 = vperm.xlu2 %973, %v525_v44   ;;  %463 = vperm.xlu0 %971, %v413_v45  }
  0x5d   :  { %v1217_v0 = vpop.permute.xlu2 %140 }
  0x62   :  { %453 = vperm.xlu1 %972, %v411_v46  }
  0x63   :  { %458 = vperm.xlu2 %973, %v412_v47   ;;  %580 = vperm.xlu0 %971, %v526_v48  }
  0x65   :  { %v1232_v8 = vpop.permute.xlu2 %145 }
  0x6a   :  { %570 = vperm.xlu1 %972, %v524_v49  }
  0x6b   :  { %443 = vperm.xlu2 %973, %v409_v50   ;;  %565 = vperm.xlu0 %971, %v523_v51  }
  0x6d   :  { %v1254_v18 = vpop.permute.xlu2 %210 }
  0x72   :  { %555 = vperm.xlu1 %972, %v521_v52  }
  0x73   :  { %560 = vperm.xlu2 %973, %v522_v53   ;;  %448 = vperm.xlu0 %971, %v410_v54  }
  0x74   :  { %v1204_v59 = vpop.permute.xlu1 %220 }
  0x75   :  { %v1196_v56 = vpop.permute.xlu0 %150  ;;  %v241_v25 = vpop.permute.xlu2 %240 }
  0x7a   :  { %438 = vperm.xlu1 %972, %v408_v55  }
  0x7b   :  { %545 = vperm.xlu2 %973, %v519_v57   ;;  %433 = vperm.xlu0 %971, %v407_v58  }
  0x7c   :  { %v1219_v1 = vpop.permute.xlu1 %245 }
  0x7d   :  { %v1215_v63 = vpop.permute.xlu0 %175  ;;  %v156_v32 = vpop.permute.xlu2 %155 }
  0x82   :  { %428 = vperm.xlu1 %972, %v406_v60  }
  0x83   :  { %535 = vperm.xlu2 %973, %v517_v61   ;;  %550 = vperm.xlu0 %971, %v520_v62  }
  0x84   :  { %v171_v10 = vpop.permute.xlu1 %170 }
  0x85   :  { %v1230_v6 = vpop.permute.xlu0 %165  ;;  %v206_v46 = vpop.permute.xlu2 %205 }
  0x86   :  { %v93_v2 = vpop.f32.mrf.mxu0 }
  0x8a   :  { %671 = vperm.xlu1 %972, %v661_v3  }
  0x8b   :  { %676 = vperm.xlu2 %973, %v662_v4   ;;  %540 = vperm.xlu0 %971, %v518_v5  }
  0x8c   :  { %v236_v19 = vpop.permute.xlu1 %235 }
  0x8d   :  { %v1243_v13 = vpop.permute.xlu0 %215 }
  0x8e   :  { %v95_v7 = vpop.f32.mrf.mxu0 }
  0x92   :  { %686 = vperm.xlu1 %972, %v664_v9  }
  0x93   :  { %691 = vperm.xlu2 %973, %v665_v11   ;;  %681 = vperm.xlu0 %971, %v663_v12  }
  0x94   :  { %v136_v26 = vpop.permute.xlu1 %135 }
  0x95   :  { %v131_v22 = vpop.permute.xlu0 %130  ;;  %v179_v40 = vmul.f32 %v136_v26, %v95_v7 }
  0x96   :  { %v98_v14 = vpop.f32.mrf.mxu0  ;;  %v178_v41 = vmul.f32 %v131_v22, %v93_v2 }
  0x97   :  { %v249_v48 = vadd.f32 %v206_v46, %v179_v40  ;;  %v180_v4 = vmul.f32 %v1217_v0, %v98_v14 }
  0x9a   :  { %780 = vperm.xlu1 %972, %v770_v15  }
  0x9b   :  { %785 = vperm.xlu2 %973, %v771_v16   ;;  %696 = vperm.xlu0 %971, %v666_v17  }
  0x9c   :  { %v201_v33 = vpop.permute.xlu1 %200 }
  0x9d   :  { %v161_v31 = vpop.permute.xlu0 %160  ;;  %v248_v44 = vadd.f32 %v201_v33, %v178_v41 }
  0x9e   :  { %v100_v20 = vpop.f32.mrf.mxu0 }
  0x9f   :  { %v181_v61 = vmul.f32 %v1232_v8, %v100_v20  ;;  %v961_v20 = vld [vmem:[%s1386_s2 + $0x38] sm:$0xff] }
  0xa1   :  { %v251_v11 = vadd.f32 %v1243_v13, %v181_v61  ;;  %v955_v13 = vld [vmem:[%s1386_s2 + $0x8] sm:$0xff] }
  0xa2   :  { %795 = vperm.xlu1 %972, %v773_v21   ;;  %v424_v21 = vpop.permute.xlu2 %423 }
  0xa3   :  { %701 = vperm.xlu2 %973, %v667_v23   ;;  %790 = vperm.xlu0 %971, %v772_v24  }
  0xa4   :  { %v231_v47 = vpop.permute.xlu1 %230 }
  0xa5   :  { %v226_v39 = vpop.permute.xlu0 %225 }
  0xa6   :  { %v103_v27 = vpop.f32.mrf.mxu0 }
  0xa7   :  { %v182_v60 = vmul.f32 %v1196_v56, %v103_v27  ;;  %v250_v56 = vadd.f32 %v1254_v18, %v180_v4  ;;  %v960_v18 = vld [vmem:[%s1386_s2 + $0x30] sm:$0xff] }
  0xa9   :  { %v252_v7 = vadd.f32 %v1204_v59, %v182_v60  ;;  %v954_v59 = vld [vmem:[%s1386_s2] sm:$0xff] }
  0xaa   :  { %706 = vperm.xlu1 %972, %v668_v28   ;;  %v606_v23 = vpop.permute.xlu2 %605 }
  0xab   :  { %805 = vperm.xlu2 %973, %v775_v29   ;;  %800 = vperm.xlu0 %971, %v774_v30   ;;  %v958_v30 = vld [vmem:[%s1386_s2 + $0x20] sm:$0xff] }
  0xac   :  { %v499_v24 = vpop.permute.xlu1 %498 }
  0xad   :  { %v494_v22 = vpop.permute.xlu0 %493 }
  0xae   :  { %v105_v34 = vpop.f32.mrf.mxu0 }
  0xaf   :  { %v183_v38 = vmul.f32 %v156_v32, %v105_v34 }
  0xb1   :  { %v253_v42 = vadd.f32 %v226_v39, %v183_v38 }
  0xb2   :  { %815 = vperm.xlu1 %972, %v777_v35   ;;  %v489_v27 = vpop.permute.xlu2 %488 }
  0xb3   :  { %842 = vperm.xlu2 %973, %v839_v36   ;;  %810 = vperm.xlu0 %971, %v776_v37   ;;  %v258_v50 = vmax.f32 %v248_v44, %v253_v42 }
  0xb4   :  { %v484_v28 = vpop.permute.xlu1 %483 }
  0xb5   :  { %v263_v52 = vmax.f32 %v258_v50, 0.0  ;;  %v611_v26 = vpop.permute.xlu0 %610 }
  0xb6   :  { %v108_v43 = vpop.f32.mrf.mxu0 }
  0xb7   :  { %v184_v45 = vmul.f32 %v161_v31, %v108_v43 }
  0xb9   :  { %v254_v49 = vadd.f32 %v231_v47, %v184_v45 }
  0xba   :  { %v474_v31 = vpop.permute.xlu2 %473 }
  0xbb   :  { %v259_v51 = vmax.f32 %v249_v48, %v254_v49 }
  0xbc   :  { %v601_v32 = vpop.permute.xlu1 %600 }
  0xbd   :  { %v264_v53 = vmax.f32 %v259_v51, 0.0  ;;  %v596_v29 = vpop.permute.xlu0 %595 }
  0xbe   :  { %v110_v54 = vpop.f32.mrf.mxu0 }
  0xbf   :  { %v284_v55 = vpack.c.bf16 %v264_v53, %v263_v52  ;;  %v185_v62 = vmul.f32 %v1230_v6, %v110_v54 }
  0xc1   :  { %v255_v12 = vadd.f32 %v236_v19, %v185_v62  ;;  %v956_v19 = vld [vmem:[%s1386_s2 + $0x10] sm:$0xff] }
  0xc2   :  { %v591_v34 = vpop.permute.xlu2 %590 }
  0xc3   :  { %v260_v6 = vmax.f32 %v250_v56, %v255_v12 }
  0xc4   :  { %v586_v35 = vpop.permute.xlu1 %585 }
  0xc5   :  { %v265_v0 = vmax.f32 %v260_v6, 0.0  ;;  %v479_v33 = vpop.permute.xlu0 %478 }
  0xc6   :  { %v113_v57 = vpop.f32.mrf.mxu0 }
  0xc7   :  { %v186_v58 = vmul.f32 %v171_v10, %v113_v57 }
  0xc9   :  { %v256_v5 = vadd.f32 %v241_v25, %v186_v58  ;;  %v957_v25 = vld [vmem:[%s1386_s2 + $0x18] sm:$0xff] }
  0xca   :  { %v1326_v37 = vpop.permute.xlu2 %575 }
  0xcb   :  { %v261_v15 = vmax.f32 %v251_v11, %v256_v5 }
  0xcc   :  { %v1328_v38 = vpop.permute.xlu1 %468 }
  0xcd   :  { %v266_v17 = vmax.f32 %v261_v15, 0.0  ;;  %v1324_v36 = vpop.permute.xlu0 %463 }
  0xce   :  { %v115_v2 = vpop.f32.mrf.mxu0 }
  0xcf   :  { %v187_v3 = vmul.f32 %v1215_v63, %v115_v2  ;;  %v285_v14 = vpack.c.bf16 %v266_v17, %v265_v0 }
  0xd1   :  { %v257_v9 = vadd.f32 %v1219_v1, %v187_v3  ;;  %v959_v1 = vld [vmem:[%s1386_s2 + $0x28] sm:$0xff] }
  0xd2   :  { %v459_v40 = vpop.permute.xlu2 %458 }
  0xd3   :  { %v262_v10 = vmax.f32 %v252_v7, %v257_v9 }
  0xd4   :  { %v1332_v41 = vpop.permute.xlu1 %453 }
  0xd5   :  { %v267_v8 = vmax.f32 %v262_v10, 0.0  ;;  %v1330_v39 = vpop.permute.xlu0 %580 }
  0xd7   :  { %v286_v16 = vpack.c.bf16 %v267_v8, %v267_v8 }
  0xd9   :  { %v354_v63 = vsel %vm352_vm2, %v286_v16, 0 }
  0xda   :  { %361 = vmatpush.bf16.msra.mxu1 %v354_v63  ;;  %966 = vmatpush.bf16.msra.mxu3 %v354_v63  ;;  %v1336_v43 = vpop.permute.xlu2 %443 }
  0xdc   :  { %v1338_v44 = vpop.permute.xlu1 %570 }
  0xdd   :  { %v1334_v42 = vpop.permute.xlu0 %565 }
  0xde   :  { %362 = vmatpush.bf16.msra.mxu1 %v285_v14  ;;  %967 = vmatpush.bf16.msra.mxu3 %v285_v14 }
  0xe2   :  { %363 = vmatpush.bf16.msra.mxu1 %v284_v55  ;;  %968 = vmatpush.bf16.msra.mxu3 %v284_v55  ;;  %v1340_v46 = vpop.permute.xlu2 %560 }
  0xe4   :  { %v1342_v47 = vpop.permute.xlu1 %555 }
  0xe5   :  { %924 = vmatmul.msk.bf16.vlgmr.msra.gmra.mxu1 %vm327_vm3, %v954_v59  ;;  %929 = vmatmul.msk.bf16.vlgmr.msra.gmra.mxu3 %vm327_vm3, %v959_v1  ;;  %v449_v45 = vpop.permute.xlu0 %448 }
  0xea   :  { %v1346_v49 = vpop.permute.xlu2 %545 }
  0xec   :  { %v1348_v50 = vpop.permute.xlu1 %438 }
  0xed   :  { %v1344_v48 = vpop.permute.xlu0 %433 }
  0xf2   :  { %v536_v55 = vpop.permute.xlu2 %535 }
  0xf4   :  { %v429_v57 = vpop.permute.xlu1 %428 }
  0xf5   :  { %925 = vmatmul.msk.bf16.gmra.mxu1 %vm327_vm3, %v955_v13  ;;  %930 = vmatmul.msk.bf16.gmra.mxu3 %vm327_vm3, %v960_v18  ;;  %v1350_v51 = vpop.permute.xlu0 %550 }
  0xfd   :  { %v541_v62 = vpop.permute.xlu0 %540 }
 0x105   :  { %926 = vmatmul.msk.bf16.gmra.mxu1 %vm327_vm3, %v956_v19  ;;  %931 = vmatmul.msk.bf16.gmra.mxu3 %vm327_vm3, %v961_v20 }
 0x115   :  { %927 = vmatmul.msk.bf16.gmra.mxu1 %vm327_vm3, %v957_v25 }
 0x125   :  { %928 = vmatmul.msk.bf16.gmra.mxu1 %vm327_vm3, %v958_v30 }
 0x162   :  { %v365_v52 = vpop.f32.mrf.mxu1 }
 0x163   :  { %v501_v53 = vmul.f32 %v424_v21, %v365_v52 }
 0x165   :  { %v613_v60 = vadd.f32 %v536_v55, %v501_v53 }
 0x167   :  { %v629_v3 = vmax.f32 %v613_v60, 0.0 }
 0x168   :  { %v390_v54 = vpop.f32.mrf.mxu3 }
 0x169   :  { %v511_v19 = vmul.f32 %v474_v31, %v390_v54 }
 0x16a   :  { %v367_v58 = vpop.f32.mrf.mxu1 }
 0x16b   :  { %v502_v61 = vmul.f32 %v429_v57, %v367_v58  ;;  %v623_v55 = vadd.f32 %v586_v35, %v511_v19 }
 0x16d   :  { %v614_v2 = vadd.f32 %v541_v62, %v502_v61 }
 0x16f   :  { %v630_v4 = vmax.f32 %v614_v2, 0.0 }
 0x170   :  { %v392_v5 = vpop.f32.mrf.mxu3 }
 0x171   :  { %v1352_v7 = vpack.c.bf16 %v630_v4, %v629_v3  ;;  %v512_v1 = vmul.f32 %v479_v33, %v392_v5 }
 0x172   :  { %v370_v9 = vpop.f32.mrf.mxu1 }
 0x173   :  { %v624_v30 = vadd.f32 %v591_v34, %v512_v1 }
 0x178   :  { %v395_v11 = vpop.f32.mrf.mxu3 }
 0x179   :  { %v513_v63 = vmul.f32 %v484_v28, %v395_v11  ;;  %v639_v28 = vmax.f32 %v623_v55, 0.0 }
 0x17a   :  { %v372_v12 = vpop.f32.mrf.mxu1 }
 0x17b   :  { %v625_v20 = vadd.f32 %v596_v29, %v513_v63 }
 0x17d   :  { %v641_v57 = vmax.f32 %v625_v20, 0.0 }
 0x180   :  { %v397_v10 = vpop.f32.mrf.mxu3 }
 0x181   :  { %v514_v16 = vmul.f32 %v489_v27, %v397_v10  ;;  %v640_v27 = vmax.f32 %v624_v30, 0.0 }
 0x182   :  { %v375_v56 = vpop.f32.mrf.mxu1 }
 0x183   :  { %v626_v13 = vadd.f32 %v601_v32, %v514_v16  ;;  %v505_v61 = vmul.f32 %v1336_v43, %v375_v56  ;;  %v672_v56 = vpop.permute.xlu1 %671 }
 0x185   :  { %v642_v52 = vmax.f32 %v626_v13, 0.0 }
 0x187   :  { %v659_v58 = vpack.c.bf16 %v642_v52, %v641_v57 }
 0x188   :  { %v400_v15 = vpop.f32.mrf.mxu3 }
 0x189   :  { %v515_v6 = vmul.f32 %v494_v22, %v400_v15  ;;  %v682_v15 = vpop.permute.xlu0 %681 }
 0x18a   :  { %v377_v8 = vpop.f32.mrf.mxu1 }
 0x18b   :  { %v627_v14 = vadd.f32 %v606_v23, %v515_v6  ;;  %v658_v23 = vpack.c.bf16 %v640_v27, %v639_v28  ;;  %v506_v35 = vmul.f32 %v449_v45, %v377_v8  ;;  %v687_v6 = vpop.permute.xlu1 %686 }
 0x18d   :  { %v643_v21 = vmax.f32 %v627_v14, 0.0 }
 0x190   :  { %v402_v17 = vpop.f32.mrf.mxu3 }
 0x191   :  { %v516_v0 = vmul.f32 %v499_v24, %v402_v17  ;;  %v697_v63 = vpop.permute.xlu0 %696 }
 0x192   :  { %v380_v59 = vpop.f32.mrf.mxu1 }
 0x193   :  { %v628_v18 = vadd.f32 %v611_v26, %v516_v0  ;;  %v507_v32 = vmul.f32 %v1332_v41, %v380_v59  ;;  %v781_v0 = vpop.permute.xlu1 %780 }
 0x195   :  { %v644_v25 = vmax.f32 %v628_v18, 0.0  ;;  %v619_v62 = vadd.f32 %v1334_v42, %v507_v32 }
 0x197   :  { %v660_v53 = vpack.c.bf16 %v644_v25, %v643_v21  ;;  %v635_v45 = vmax.f32 %v619_v62, 0.0 }
 0x199   :  { %733 = vmatpush.bf16.msra.mxu2 %v660_v53  ;;  %v791_v1 = vpop.permute.xlu0 %790 }
 0x19a   :  { %v382_v22 = vpop.f32.mrf.mxu1 }
 0x19b   :  { %v508_v31 = vmul.f32 %v459_v40, %v382_v22  ;;  %v618_v40 = vadd.f32 %v1340_v46, %v506_v35  ;;  %v796_v18 = vpop.permute.xlu1 %795 }
 0x19d   :  { %734 = vmatpush.bf16.msra.mxu2 %v659_v58  ;;  %v620_v54 = vadd.f32 %v1338_v44, %v508_v31  ;;  %v634_v44 = vmax.f32 %v618_v40, 0.0 }
 0x19f   :  { %v636_v41 = vmax.f32 %v620_v54, 0.0 }
 0x1a1   :  { %735 = vmatpush.bf16.msra.mxu2 %v658_v23  ;;  %v656_v43 = vpack.c.bf16 %v636_v41, %v635_v45  ;;  %v801_v22 = vpop.permute.xlu0 %800 }
 0x1a2   :  { %v385_v24 = vpop.f32.mrf.mxu1 }
 0x1a3   :  { %v509_v26 = vmul.f32 %v1324_v36, %v385_v24  ;;  %v504_v36 = vmul.f32 %v1348_v50, %v372_v12  ;;  %v707_v32 = vpop.permute.xlu1 %706 }
 0x1a5   :  { %v621_v33 = vadd.f32 %v1326_v37, %v509_v26  ;;  %v503_v37 = vmul.f32 %v1344_v48, %v370_v9  ;;  %v963_v48 = vld [vmem:[%s1387_s3 + $0x8] sm:$0xff] }
 0x1a7   :  { %v637_v2 = vmax.f32 %v621_v33, 0.0  ;;  %v615_v42 = vadd.f32 %v1346_v49, %v503_v37  ;;  %v964_v49 = vld [vmem:[%s1387_s3 + $0x10] sm:$0xff] }
 0x1a9   :  { %v631_v12 = vmax.f32 %v615_v42, 0.0 }
 0x1aa   :  { %v387_v29 = vpop.f32.mrf.mxu1 }
 0x1ab   :  { %v510_v34 = vmul.f32 %v1328_v38, %v387_v29  ;;  %v617_v38 = vadd.f32 %v1342_v47, %v505_v61  ;;  %v962_v47 = vld [vmem:[%s1387_s3] sm:$0xff] }
 0x1ad   :  { %v622_v60 = vadd.f32 %v1330_v39, %v510_v34  ;;  %v616_v39 = vadd.f32 %v1350_v51, %v504_v36  ;;  %v633_v5 = vmax.f32 %v617_v38, 0.0  ;;  %v965_v51 = vld [vmem:[%s1387_s3 + $0x18] sm:$0xff]  ;;  %v811_v36 = vpop.permute.xlu0 %810  ;;  %s1001_s3 = smov [#allocation2]  }
 0x1ae   :  { %s852_s0 = sshll.u32 %s1001_s3, 4  ;;  %s853_s0 = int_to_ptr.vmem [resolvable:$true] %s852_s0 }
 0x1af   :  { %v638_v3 = vmax.f32 %v622_v60, 0.0  ;;  %v632_v11 = vmax.f32 %v616_v39, 0.0  ;;  %v655_v50 = vpack.c.bf16 %v634_v44, %v633_v5  ;;  %v816_v39 = vpop.permute.xlu1 %815 }
 0x1b1   :  { %v657_v4 = vpack.c.bf16 %v638_v3, %v637_v2  ;;  %v654_v46 = vpack.c.bf16 %v632_v11, %v631_v12 }
 0x1b3   :  { %736 = vmatpush.bf16.msra.mxu2 %v657_v4 }
 0x1b7   :  { %737 = vmatpush.bf16.msra.mxu2 %v656_v43 }
 0x1bb   :  { %738 = vmatpush.bf16.msra.mxu2 %v655_v50 }
 0x1bf   :  { %739 = vmatpush.bf16.msra.mxu2 %v654_v46 }
 0x1c3   :  { %740 = vmatpush.bf16.msra.mxu2 %v1352_v7  ;;  %v677_v7 = vpop.permute.xlu2 %676 }
 0x1c6   :  { %741 = vmatmul.bf16.vlgmr.msra.gmra.mxu2 %v962_v47 }
 0x1cb   :  { %v692_v16 = vpop.permute.xlu2 %691 }
 0x1d3   :  { %v786_v59 = vpop.permute.xlu2 %785 }
 0x1d6   :  { %746 = vmatmul.bf16.gmra.mxu2 %v963_v48 }
 0x1db   :  { %v702_v52 = vpop.permute.xlu2 %701 }
 0x1e3   :  { %v806_v62 = vpop.permute.xlu2 %805 }
 0x1e6   :  { %751 = vmatmul.bf16.gmra.mxu2 %v964_v49 }
 0x1eb   :  { %v843_v48 = vpop.permute.xlu2 %842 }
 0x1f6   :  { %756 = vmatmul.bf16.gmra.mxu2 %v965_v51 }
 0x249   :  { %v742_v9 = vpop.f32.mrf.mxu2 }
 0x24a   :  { %v743_v20 = vadd.f32 %v742_v9, %v672_v56 }
 0x24c   :  { %v762_v53 = vmax.f32 %v743_v20, 0.0 }
 0x24e   :  { %v818_v24 = vmul.f32 %v781_v0, %v762_v53 }
 0x251   :  { %v744_v10 = vpop.f32.mrf.mxu2 }
 0x252   :  { %v745_v13 = vadd.f32 %v744_v10, %v677_v7 }
 0x254   :  { %v763_v25 = vmax.f32 %v745_v13, 0.0 }
 0x256   :  { %v819_v27 = vmul.f32 %v786_v59, %v763_v25 }
 0x258   :  { %v826_v33 = vadd.f32 %v819_v27, %v818_v24 }
 0x259   :  { %v747_v8 = vpop.f32.mrf.mxu2 }
 0x25a   :  { %v748_v21 = vadd.f32 %v747_v8, %v682_v15 }
 0x25c   :  { %v764_v55 = vmax.f32 %v748_v21, 0.0 }
 0x25e   :  { %v820_v26 = vmul.f32 %v791_v1, %v764_v55 }
 0x260   :  { %v827_v54 = vadd.f32 %v826_v33, %v820_v26 }
 0x261   :  { %v749_v17 = vpop.f32.mrf.mxu2 }
 0x262   :  { %v750_v30 = vadd.f32 %v749_v17, %v687_v6 }
 0x264   :  { %v765_v58 = vmax.f32 %v750_v30, 0.0 }
 0x266   :  { %v821_v34 = vmul.f32 %v796_v18, %v765_v58 }
 0x268   :  { %v828_v2 = vadd.f32 %v827_v54, %v821_v34 }
 0x269   :  { %v752_v14 = vpop.f32.mrf.mxu2 }
 0x26a   :  { %v753_v57 = vadd.f32 %v752_v14, %v692_v16 }
 0x26c   :  { %v766_v31 = vmax.f32 %v753_v57, 0.0 }
 0x26e   :  { %v822_v60 = vmul.f32 %v801_v22, %v766_v31 }
 0x270   :  { %v829_v41 = vadd.f32 %v828_v2, %v822_v60 }
 0x271   :  { %v754_v19 = vpop.f32.mrf.mxu2 }
 0x272   :  { %v755_v28 = vadd.f32 %v754_v19, %v697_v63 }
 0x274   :  { %v767_v35 = vmax.f32 %v755_v28, 0.0 }
 0x276   :  { %v823_v3 = vmul.f32 %v806_v62, %v767_v35 }
 0x278   :  { %v830_v38 = vadd.f32 %v829_v41, %v823_v3 }
 0x279   :  { %v757_v23 = vpop.f32.mrf.mxu2 }
 0x27a   :  { %v758_v29 = vadd.f32 %v757_v23, %v702_v52 }
 0x27c   :  { %v768_v61 = vmax.f32 %v758_v29, 0.0 }
 0x27e   :  { %v824_v4 = vmul.f32 %v811_v36, %v768_v61 }
 0x280   :  { %v831_v44 = vadd.f32 %v830_v38, %v824_v4 }
 0x281   :  { %v759_v40 = vpop.f32.mrf.mxu2 }
 0x282   :  { %v760_v37 = vadd.f32 %v759_v40, %v707_v32 }
 0x284   :  { %v769_v45 = vmax.f32 %v760_v37, 0.0 }
 0x286   :  { %v825_v43 = vmul.f32 %v816_v39, %v769_v45 }
 0x288   :  { %v832_v42 = vadd.f32 %v831_v44, %v825_v43 }
 0x28a   :  { %v833_v5 = vrot.slane %v832_v42, 4 }
 0x28c   :  { %v834_v11 = vadd.f32 %v833_v5, %v832_v42 }
 0x28e   :  { %v835_v50 = vrot.slane %v834_v11, 2 }
 0x290   :  { %v836_v12 = vadd.f32 %v835_v50, %v834_v11 }
 0x292   :  { %v837_v46 = vrot.slane %v836_v12, 1 }
 0x294   :  { %v838_v47 = vadd.f32 %v837_v46, %v836_v12 }
 0x296   :  { %v845_v49 = vadd.f32 %v843_v48, %v838_v47 }
 0x298   :  { %846 = vst [vmem:[#allocation2] sm:$0x1] %v845_v49 }
 0x299   :  { %857 = dma.vmem_to_hbm [thread:$0]  %s853_s0, 16, %s855_s9, [#allocation3]  }
 0x29a   :  { %998 = dma.done.wait [#allocation3], 16  }
 0x29b   :  { %999 = vsyncadd [#allocation3], 4294967280 }
 0x29c   :  { %862 = vsyncpa [#allocation3], 1 }

</bundles_post_ra>
